<compile_context>
chip_gen: v6e
topology: v6e:2x2x1
jax: 0.10.0
libtpu: 0.0.40
codegen_flags: <defaults>
</compile_context>

<pallas_src>
import functools

import jax
import jax.numpy as jnp
from jax.experimental import pallas as pl
from jax.experimental.pallas import tpu as pltpu

_LANE = 128      # lane width of a vreg
_SUBLANE = 8     # sublane count of a vreg (f32)


def _round_up(x, m):
    return (x + m - 1) // m * m


def _policy_kernel(num_valid_actions,
                   state_ref, w1_ref, b1_ref, w2_ref, b2_ref, w3_ref, b3_ref,
                   out_ref):
    """One batch tile: (TB, D_in) -> (TB, A_padded) softmax probabilities."""
    x = state_ref[...]                                                     # (TB, D_in)

    # --- linear1 + relu ---
    h1 = jnp.dot(x, w1_ref[...], preferred_element_type=jnp.float32) + b1_ref[...]
    h1 = jnp.maximum(h1, 0.0)                                              # (TB, Hp)

    # --- linear2 + relu ---
    h2 = jnp.dot(h1, w2_ref[...], preferred_element_type=jnp.float32) + b2_ref[...]
    h2 = jnp.maximum(h2, 0.0)                                              # (TB, Hp)

    # --- linear3 ---
    logits = jnp.dot(h2, w3_ref[...], preferred_element_type=jnp.float32) + b3_ref[...]

    # Mask the zero-padded action lanes so the softmax is over the true actions.
    col = jax.lax.broadcasted_iota(jnp.int32, logits.shape, 1)
    logits = jnp.where(col < num_valid_actions, logits, -jnp.inf)

    # Numerically stable softmax over actions (dim=1). Padded lanes -> exactly 0.
    m = jnp.max(logits, axis=1, keepdims=True)
    e = jnp.exp(logits - m)
    denom = jnp.sum(e, axis=1, keepdims=True)
    out_ref[...] = e * pl.reciprocal(denom, approx=False)                  # (TB, Ap)


def policy_network_forward(state, w1, b1, w2, b2, w3, b3, *, block_b=512):
    """state: (B, num_inputs) f32; w_i transposed to (in, out); b_i shaped (1, out)."""
    B, D = state.shape
    H = w1.shape[1]
    A = w3.shape[1]

    # Lane-pad hidden/action dims to 128 (zeros are inert through matmul + relu;
    # padded action logits are -inf-masked inside the kernel).
    Hp = _round_up(H, _LANE)
    Ap = _round_up(A, _LANE)
    w1p = jnp.pad(w1, ((0, 0), (0, Hp - H)))
    b1p = jnp.pad(b1, ((0, 0), (0, Hp - H)))
    w2p = jnp.pad(w2, ((0, Hp - H), (0, Hp - H)))
    b2p = jnp.pad(b2, ((0, 0), (0, Hp - H)))
    w3p = jnp.pad(w3, ((0, Hp - H), (0, Ap - A)))
    b3p = jnp.pad(b3, ((0, 0), (0, Ap - A)))

    # Batch tile: multiple of 8 sublanes, capped at block_b; pad B up to a
    # whole number of tiles (padded rows produce valid-but-discarded softmax rows).
    TB = min(block_b, _round_up(B, _SUBLANE))
    Bp = _round_up(B, TB)
    state_p = jnp.pad(state, ((0, Bp - B), (0, 0))) if Bp != B else state

    grid = (Bp // TB,)
    kernel = functools.partial(_policy_kernel, A)
    const2d = lambda shape: pl.BlockSpec(shape, lambda i: (0, 0))  # resident weights

    out_padded = pl.pallas_call(
        kernel,
        out_shape=jax.ShapeDtypeStruct((Bp, Ap), jnp.float32),
        grid=grid,
        in_specs=[
            pl.BlockSpec((TB, D), lambda i: (i, 0)),   # streamed batch tile
            const2d((D, Hp)), const2d((1, Hp)),
            const2d((Hp, Hp)), const2d((1, Hp)),
            const2d((Hp, Ap)), const2d((1, Ap)),
        ],
        out_specs=pl.BlockSpec((TB, Ap), lambda i: (i, 0)),
        compiler_params=pltpu.CompilerParams(
            dimension_semantics=("parallel",),  # shard batch tiles across v7x's 2 TCs
        ),
    )(state_p, w1p, b1p, w2p, b2p, w3p, b3p)

    # TODO(synk): for production RL rollouts, fuse the categorical action draw
    # (pltpu.prng_seed / prng_random_bits) into this kernel to amortize dispatch.
    return out_padded[:B, :A]


def init_params(key, num_inputs, num_actions, hidden_size, init_w=0.003):
    """Deterministic init mirroring the PyTorch module's __init__."""
    k1, k2, k3, k4, k5, k6 = jax.random.split(key, 6)
    lim1 = 1.0 / jnp.sqrt(jnp.float32(num_inputs))
    lim2 = 1.0 / jnp.sqrt(jnp.float32(hidden_size))
    w1 = jax.random.uniform(k1, (num_inputs, hidden_size), jnp.float32, -lim1, lim1)
    b1 = jax.random.uniform(k2, (1, hidden_size), jnp.float32, -lim1, lim1)
    w2 = jax.random.uniform(k3, (hidden_size, hidden_size), jnp.float32, -lim2, lim2)
    b2 = jax.random.uniform(k4, (1, hidden_size), jnp.float32, -lim2, lim2)
    w3 = jax.random.uniform(k5, (hidden_size, num_actions), jnp.float32, -init_w, init_w)
    b3 = jax.random.uniform(k6, (1, num_actions), jnp.float32, -init_w, init_w)
    return w1, b1, w2, b2, w3, b3


if __name__ == "__main__":
    num_inputs, num_actions, hidden_size = 16, 8, 32
    batch = 8

    key = jax.random.PRNGKey(0)
    k_state, k_params = jax.random.split(key)
    state = jax.random.normal(k_state, (batch, num_inputs), jnp.float32)
    params = init_params(k_params, num_inputs, num_actions, hidden_size)

    probs = policy_network_forward(state, *params)
    probs = jax.block_until_ready(probs)

    # reference check in plain JAX
    w1, b1, w2, b2, w3, b3 = params
    h = jnp.maximum(state @ w1 + b1, 0.0)
    h = jnp.maximum(h @ w2 + b2, 0.0)
    ref = jax.nn.softmax(h @ w3 + b3, axis=1)
    assert probs.shape == (batch, num_actions)
    assert jnp.allclose(probs, ref, atol=1e-5, rtol=1e-5)
    assert jnp.allclose(jnp.sum(probs, axis=1), 1.0, atol=1e-5)

    print("KERNEL_OK")
</pallas_src>

<mosaic_0001>
module attributes {stable_mosaic.version = 11 : i64} {
  func.func @_policy_kernel(%arg0: i32, %arg1: memref<8x16xf32, #tpu.memory_space<vmem>>, %arg2: memref<16x128xf32, #tpu.memory_space<vmem>>, %arg3: memref<1x128xf32, #tpu.memory_space<vmem>>, %arg4: memref<128x128xf32, #tpu.memory_space<vmem>>, %arg5: memref<1x128xf32, #tpu.memory_space<vmem>>, %arg6: memref<128x128xf32, #tpu.memory_space<vmem>>, %arg7: memref<1x128xf32, #tpu.memory_space<vmem>>, %arg8: memref<8x128xf32, #tpu.memory_space<vmem>>) attributes {dimension_semantics = [#tpu.dimension_semantics<parallel>], iteration_bounds = array<i64: 1>, scalar_prefetch = 0 : i64, scratch_operands = 0 : i64, tpu.core_type = #tpu.core_type<tc>, window_params = [{transform_indices = @transform_0, window_bounds = array<i64: 8, 16>}, {pipeline_mode = #tpu.pipeline_mode<synchronous>, transform_indices = @transform_1, window_bounds = array<i64: 16, 128>}, {pipeline_mode = #tpu.pipeline_mode<synchronous>, transform_indices = @transform_2, window_bounds = array<i64: 1, 128>}, {pipeline_mode = #tpu.pipeline_mode<synchronous>, transform_indices = @transform_3, window_bounds = array<i64: 128, 128>}, {pipeline_mode = #tpu.pipeline_mode<synchronous>, transform_indices = @transform_4, window_bounds = array<i64: 1, 128>}, {pipeline_mode = #tpu.pipeline_mode<synchronous>, transform_indices = @transform_5, window_bounds = array<i64: 128, 128>}, {pipeline_mode = #tpu.pipeline_mode<synchronous>, transform_indices = @transform_6, window_bounds = array<i64: 1, 128>}, {transform_indices = @transform_7, window_bounds = array<i64: 8, 128>}]} {
    %c0 = arith.constant 0 : index
    %c0_0 = arith.constant 0 : index
    %0 = vector.load %arg1[%c0, %c0_0] : memref<8x16xf32, #tpu.memory_space<vmem>>, vector<8x16xf32>
    %c0_1 = arith.constant 0 : index
    %c0_2 = arith.constant 0 : index
    %1 = vector.load %arg2[%c0_1, %c0_2] : memref<16x128xf32, #tpu.memory_space<vmem>>, vector<16x128xf32>
    %cst = arith.constant dense<0.000000e+00> : vector<8x128xf32>
    %2 = tpu.matmul %0, %1, %cst {dimension_numbers = #tpu.dot_dimension_numbers<[1], [0], [0], [1], [0, 0, 1, 1], [], []>} : vector<8x16xf32>, vector<16x128xf32>, vector<8x128xf32> -> vector<8x128xf32>
    %c0_3 = arith.constant 0 : index
    %c0_4 = arith.constant 0 : index
    %3 = vector.load %arg3[%c0_3, %c0_4] : memref<1x128xf32, #tpu.memory_space<vmem>>, vector<1x128xf32>
    %4 = vector.broadcast %3 : vector<1x128xf32> to vector<8x128xf32>
    %5 = arith.addf %2, %4 : vector<8x128xf32>
    %cst_5 = arith.constant 0.000000e+00 : f32
    %6 = vector.broadcast %cst_5 : f32 to vector<8x128xf32>
    %7 = arith.maximumf %5, %6 : vector<8x128xf32>
    %c0_6 = arith.constant 0 : index
    %c0_7 = arith.constant 0 : index
    %8 = vector.load %arg4[%c0_6, %c0_7] : memref<128x128xf32, #tpu.memory_space<vmem>>, vector<128x128xf32>
    %cst_8 = arith.constant dense<0.000000e+00> : vector<8x128xf32>
    %9 = tpu.matmul %7, %8, %cst_8 {dimension_numbers = #tpu.dot_dimension_numbers<[1], [0], [0], [1], [0, 0, 1, 1], [], []>} : vector<8x128xf32>, vector<128x128xf32>, vector<8x128xf32> -> vector<8x128xf32>
    %c0_9 = arith.constant 0 : index
    %c0_10 = arith.constant 0 : index
    %10 = vector.load %arg5[%c0_9, %c0_10] : memref<1x128xf32, #tpu.memory_space<vmem>>, vector<1x128xf32>
    %11 = vector.broadcast %10 : vector<1x128xf32> to vector<8x128xf32>
    %12 = arith.addf %9, %11 : vector<8x128xf32>
    %cst_11 = arith.constant 0.000000e+00 : f32
    %13 = vector.broadcast %cst_11 : f32 to vector<8x128xf32>
    %14 = arith.maximumf %12, %13 : vector<8x128xf32>
    %c0_12 = arith.constant 0 : index
    %c0_13 = arith.constant 0 : index
    %15 = vector.load %arg6[%c0_12, %c0_13] : memref<128x128xf32, #tpu.memory_space<vmem>>, vector<128x128xf32>
    %cst_14 = arith.constant dense<0.000000e+00> : vector<8x128xf32>
    %16 = tpu.matmul %14, %15, %cst_14 {dimension_numbers = #tpu.dot_dimension_numbers<[1], [0], [0], [1], [0, 0, 1, 1], [], []>} : vector<8x128xf32>, vector<128x128xf32>, vector<8x128xf32> -> vector<8x128xf32>
    %c0_15 = arith.constant 0 : index
    %c0_16 = arith.constant 0 : index
    %17 = vector.load %arg7[%c0_15, %c0_16] : memref<1x128xf32, #tpu.memory_space<vmem>>, vector<1x128xf32>
    %18 = vector.broadcast %17 : vector<1x128xf32> to vector<8x128xf32>
    %19 = arith.addf %16, %18 : vector<8x128xf32>
    %20 = tpu.iota {dimensions = array<i32: 1>} : vector<8x128xi32>
    %c8_i32 = arith.constant 8 : i32
    %21 = vector.broadcast %c8_i32 : i32 to vector<8x128xi32>
    %22 = arith.cmpi slt, %20, %21 : vector<8x128xi32>
    %cst_17 = arith.constant 0xFF800000 : f32
    %23 = vector.broadcast %cst_17 : f32 to vector<8x128xf32>
    %24 = arith.select %22, %19, %23 : vector<8x128xi1>, vector<8x128xf32>
    %cst_18 = arith.constant dense<0xFF800000> : vector<8xf32>
    %25 = vector.multi_reduction <maximumf>, %24, %cst_18 [1] : vector<8x128xf32> to vector<8xf32>
    %26 = vector.shape_cast %25 : vector<8xf32> to vector<8x1xf32>
    %27 = vector.broadcast %26 : vector<8x1xf32> to vector<8x128xf32>
    %28 = arith.subf %24, %27 : vector<8x128xf32>
    %29 = math.exp %28 : vector<8x128xf32>
    %cst_19 = arith.constant dense<0.000000e+00> : vector<8xf32>
    %30 = vector.multi_reduction <add>, %29, %cst_19 [1] : vector<8x128xf32> to vector<8xf32>
    %31 = vector.shape_cast %30 : vector<8xf32> to vector<8x1xf32>
    %32 = tpu.reciprocal %31 : vector<8x1xf32> -> vector<8x1xf32>
    %33 = vector.broadcast %32 : vector<8x1xf32> to vector<8x128xf32>
    %34 = arith.mulf %29, %33 : vector<8x128xf32>
    %c0_20 = arith.constant 0 : index
    %c0_21 = arith.constant 0 : index
    %35 = vector.load %arg8[%c0_20, %c0_21] : memref<8x128xf32, #tpu.memory_space<vmem>>, vector<8x128xf32>
    tpu.vector_store %arg8[%c0_20, %c0_21], %34 {strides = array<i32>} : memref<8x128xf32, #tpu.memory_space<vmem>>, vector<8x128xf32>,
    return
  }
  func.func @transform_0(%arg0: i32) -> (i32, i32) {
    %c0_i32 = arith.constant 0 : i32
    %c0_i32_0 = arith.constant 0 : i32
    return %arg0, %c0_i32 : i32, i32
  }
  func.func @transform_1(%arg0: i32) -> (i32, i32) {
    %c0_i32 = arith.constant 0 : i32
    %c0_i32_0 = arith.constant 0 : i32
    %c0_i32_1 = arith.constant 0 : i32
    return %c0_i32, %c0_i32_0 : i32, i32
  }
  func.func @transform_2(%arg0: i32) -> (i32, i32) {
    %c0_i32 = arith.constant 0 : i32
    %c0_i32_0 = arith.constant 0 : i32
    %c0_i32_1 = arith.constant 0 : i32
    return %c0_i32, %c0_i32_0 : i32, i32
  }
  func.func @transform_3(%arg0: i32) -> (i32, i32) {
    %c0_i32 = arith.constant 0 : i32
    %c0_i32_0 = arith.constant 0 : i32
    %c0_i32_1 = arith.constant 0 : i32
    return %c0_i32, %c0_i32_0 : i32, i32
  }
  func.func @transform_4(%arg0: i32) -> (i32, i32) {
    %c0_i32 = arith.constant 0 : i32
    %c0_i32_0 = arith.constant 0 : i32
    %c0_i32_1 = arith.constant 0 : i32
    return %c0_i32, %c0_i32_0 : i32, i32
  }
  func.func @transform_5(%arg0: i32) -> (i32, i32) {
    %c0_i32 = arith.constant 0 : i32
    %c0_i32_0 = arith.constant 0 : i32
    %c0_i32_1 = arith.constant 0 : i32
    return %c0_i32, %c0_i32_0 : i32, i32
  }
  func.func @transform_6(%arg0: i32) -> (i32, i32) {
    %c0_i32 = arith.constant 0 : i32
    %c0_i32_0 = arith.constant 0 : i32
    %c0_i32_1 = arith.constant 0 : i32
    return %c0_i32, %c0_i32_0 : i32, i32
  }
  func.func @transform_7(%arg0: i32) -> (i32, i32) {
    %c0_i32 = arith.constant 0 : i32
    %c0_i32_0 = arith.constant 0 : i32
    return %arg0, %c0_i32 : i32, i32
  }
}

</mosaic_0001>

<bundles_post_ra>
// kernel: tpu_custom_call.1
= control target key start
LH: loop header
LB: loop body
LE: loop exit
PB: predicated region body
PF: predicated region fallthrough
CT: control target
= control target key end

     0   :  { %12 = vsyncpa [#allocation3], 0  ;;  %s744_s0 = inlined_call_operand.hbm [shape: f32[8,16], index: 0, kind: input, shape index: {}]   ;;  %s745_s1 = inlined_call_operand.hbm [shape: f32[16,128], index: 1, kind: input, shape index: {}]   ;;  %s746_s2 = inlined_call_operand.vmem [shape: f32[1,128], index: 2, kind: input, shape index: {}]   ;;  %s747_s3 = inlined_call_operand.hbm [shape: f32[128,128], index: 3, kind: input, shape index: {}]   ;;  %s748_s4 = inlined_call_operand.vmem [shape: f32[1,128], index: 4, kind: input, shape index: {}]   ;;  %s749_s5 = inlined_call_operand.hbm [shape: f32[128,128], index: 5, kind: input, shape index: {}]   ;;  %s750_s6 = inlined_call_operand.vmem [shape: f32[1,128], index: 6, kind: input, shape index: {}]   ;;  %s751_s7 = inlined_call_operand.hbm [shape: f32[8,128], index: 7, kind: output, shape index: {}]  }
   0x1   :  { %13 = vsyncpa [#allocation6], 0 }
   0x2   :  { %14 = vsyncpa [#allocation9], 0 }
   0x3   :  { %15 = vsyncpa [#allocation4], 0  ;;  %s622_s24 = smov [#allocation5]  }
   0x4   :  { %s31_s25 = sshll.u32 %s622_s24, 4  ;;  %s32_s25 = int_to_ptr.vmem [resolvable:$true] %s31_s25 }
   0x5   :  { %s522_s26 = scalar_lea.vmem %s32_s25, 256  ;;  %p527_p1 = scmp.lt.s32.totalorder %s32_s25, %s32_s25 }
   0x6   :  { %p523_p0 = scmp.ne.s32.totalorder %s32_s25, %s522_s26  ;;  %p528_p2 = scmp.lt.s32.totalorder %s522_s26, %s522_s26 }
   0x8   :  { %p529_p3 = por %p528_p2, %p527_p1 }
   0xa   :  { %p530_p4 = pnand %p529_p3, %p523_p0 }
   0xc   :  { %533 = shalt.err (!%p530_p4)
}
   0xd   :  { %s623_s27 = smov 128   ;;  %s624_s28 = smov 8  }
   0xe   :  { %37 = dma.hbm_to_vmem [thread:$0]  %s745_s1, 256, %s32_s25, [#allocation6], %s623_s27, %s623_s27, %s624_s28  }
   0xf   :  { %s625_s8 = smov [#allocation2]   ;;  %s626_s10 = smov [#allocation7]  }
  0x10   :  { %s22_s9 = sshll.u32 %s625_s8, 4  ;;  %s45_s11 = sshll.u32 %s626_s10, 4  ;;  %s23_s9 = int_to_ptr.vmem [resolvable:$true] %s22_s9  ;;  %s46_s11 = int_to_ptr.vmem [resolvable:$true] %s45_s11 }
  0x11   :  { %s542_s12 = scalar_lea.vmem %s23_s9, 128  ;;  %p547_p6 = scmp.lt.s32.totalorder %s23_s9, %s23_s9 }
  0x12   :  { %p543_p5 = scmp.ne.s32.totalorder %s23_s9, %s542_s12  ;;  %p548_p7 = scmp.lt.s32.totalorder %s542_s12, %s542_s12 }
  0x14   :  { %p549_p8 = por %p548_p7, %p547_p6 }
  0x16   :  { %p550_p9 = pnand %p549_p8, %p543_p5 }
  0x18   :  { %553 = shalt.err (!%p550_p9)
}
  0x19   :  { %25 = dma.hbm_to_vmem [thread:$0]  %s744_s0, 128, %s23_s9, [#allocation3]  }
  0x1a   :  { %s562_s15 = scalar_lea.vmem %s46_s11, 2048  ;;  %p567_p11 = scmp.lt.s32.totalorder %s46_s11, %s46_s11 }
  0x1b   :  { %p563_p10 = scmp.ne.s32.totalorder %s46_s11, %s562_s15  ;;  %p568_p12 = scmp.lt.s32.totalorder %s562_s15, %s562_s15 }
  0x1d   :  { %p569_p13 = por %p568_p12, %p567_p11 }
  0x1f   :  { %p570_p0 = pnand %p569_p13, %p563_p10 }
  0x21   :  { %573 = shalt.err (!%p570_p0)
}
  0x22   :  { %51 = dma.hbm_to_vmem [thread:$0]  %s747_s3, 2048, %s46_s11, [#allocation6], %s623_s27, %s623_s27, %s624_s28  }
  0x23   :  { %s627_s17 = smov [#allocation8]  }
  0x24   :  { %s59_s18 = sshll.u32 %s627_s17, 4  ;;  %s60_s18 = int_to_ptr.vmem [resolvable:$true] %s59_s18 }
  0x25   :  { %s582_s19 = scalar_lea.vmem %s60_s18, 2048  ;;  %p587_p2 = scmp.lt.s32.totalorder %s60_s18, %s60_s18 }
  0x26   :  { %p583_p1 = scmp.ne.s32.totalorder %s60_s18, %s582_s19  ;;  %p588_p3 = scmp.lt.s32.totalorder %s582_s19, %s582_s19 }
  0x28   :  { %p589_p4 = por %p588_p3, %p587_p2 }
  0x2a   :  { %p590_p5 = pnand %p589_p4, %p583_p1 }
  0x2c   :  { %593 = shalt.err (!%p590_p5)
}
  0x2d   :  { %65 = dma.hbm_to_vmem [thread:$0]  %s749_s5, 2048, %s60_s18, [#allocation9], %s623_s27, %s623_s27, %s624_s28  }
  0x2e   :  { %614 = dma.done.wait [#allocation3], 128  }
  0x2f   :  { %615 = vsyncadd [#allocation3], 4294967168 }
  0x30   :  { %616 = dma.done.wait [#allocation6], 2304  }
  0x31   :  { %617 = vsyncadd [#allocation6], 4294964992 }
  0x32   :  { %618 = dma.done.wait [#allocation9], 2048  }
  0x33   :  { %619 = vsyncadd [#allocation9], 4294965248  ;;  %v628_v0 = vmov 0.0   ;;  %vm629_vm0 = vmmov 0   ;;  %v82_v1 = vld [vmem:[#allocation5 + $0x8] sm:$0xff]  ;;  %v81_v2 = vld [vmem:[#allocation5] sm:$0xff]  ;;  %v352_v46 = vlaneseq }
  0x34   :  { %424 = vmatprep.subr.mxu0 %v628_v0  ;;  %428 = vmatprep.mubr.msk.f32.mxu0 %vm629_vm0, %v628_v0  ;;  %v80_v3 = vld [vmem:[#allocation2] sm:$0xff]  ;;  %vm90_vm1 = vcmask 130048   ;;  %v180_v4 = vld [vmem:[#allocation7 + $0x78] sm:$0xff]  ;;  %v179_v5 = vld [vmem:[#allocation7 + $0x70] sm:$0xff] }
  0x35   :  { %431 = vmatprep.subr.mxu1 %v628_v0  ;;  %463 = vmatprep.mubr.msk.f32.mxu1 %vm629_vm0, %v628_v0  ;;  %v178_v6 = vld [vmem:[#allocation7 + $0x68] sm:$0xff]  ;;  %v177_v7 = vld [vmem:[#allocation7 + $0x60] sm:$0xff]  ;;  %v176_v8 = vld [vmem:[#allocation7 + $0x58] sm:$0xff]  ;;  %v353_v47 = vand.u32 127, %v352_v46 }
  0x36   :  { %425 = vmatpush3.msra.mxu0 %v82_v1  ;;  %432 = vmatpush3.msra.mxu1 %v180_v4  ;;  %v175_v9 = vld [vmem:[#allocation7 + $0x50] sm:$0xff]  ;;  %v174_v10 = vld [vmem:[#allocation7 + $0x48] sm:$0xff]  ;;  %v173_v11 = vld [vmem:[#allocation7 + $0x40] sm:$0xff] }
  0x37   :  { %426 = vmatprep.subr.mxu0 %v628_v0  ;;  %433 = vmatprep.subr.mxu1 %v628_v0  ;;  %v172_v12 = vld [vmem:[#allocation7 + $0x38] sm:$0xff]  ;;  %v171_v13 = vld [vmem:[#allocation7 + $0x30] sm:$0xff]  ;;  %v170_v14 = vld [vmem:[#allocation7 + $0x28] sm:$0xff]  ;;  %vm354_vm2 = vcmp.lt.s32.totalorder %v353_v47, 8 }
  0x38   :  { %427 = vmatpush3.msra.mxu0 %v81_v2  ;;  %434 = vmatpush3.msra.mxu1 %v179_v5  ;;  %v169_v15 = vld [vmem:[#allocation7 + $0x20] sm:$0xff]  ;;  %v168_v16 = vld [vmem:[#allocation7 + $0x18] sm:$0xff]  ;;  %v167_v17 = vld [vmem:[#allocation7 + $0x10] sm:$0xff] }
  0x39   :  { %429 = vmatmul.mubr.msk.f32.vlgmr.msra.gmra.mxu0 %vm90_vm1, %v80_v3  ;;  %435 = vmatprep.subr.mxu1 %v628_v0  ;;  %v166_v18 = vld [vmem:[#allocation7 + $0x8] sm:$0xff]  ;;  %v165_v19 = vld [vmem:[#allocation7] sm:$0xff]  ;;  %v274_v20 = vld [vmem:[#allocation8 + $0x78] sm:$0xff] }
  0x3a   :  { %466 = vmatprep.subr.mxu0 %v628_v0  ;;  %436 = vmatpush3.msra.mxu1 %v178_v6  ;;  %v273_v21 = vld [vmem:[#allocation8 + $0x70] sm:$0xff]  ;;  %v272_v22 = vld [vmem:[#allocation8 + $0x68] sm:$0xff]  ;;  %v271_v23 = vld [vmem:[#allocation8 + $0x60] sm:$0xff] }
  0x3b   :  { %498 = vmatprep.mubr.msk.f32.mxu0 %vm629_vm0, %v628_v0  ;;  %437 = vmatprep.subr.mxu1 %v628_v0  ;;  %v270_v24 = vld [vmem:[#allocation8 + $0x58] sm:$0xff]  ;;  %v269_v25 = vld [vmem:[#allocation8 + $0x50] sm:$0xff]  ;;  %v268_v26 = vld [vmem:[#allocation8 + $0x48] sm:$0xff] }
  0x3c   :  { %438 = vmatpush3.msra.mxu1 %v177_v7  ;;  %467 = vmatpush3.msra.mxu0 %v274_v20  ;;  %v267_v27 = vld [vmem:[#allocation8 + $0x40] sm:$0xff]  ;;  %v266_v28 = vld [vmem:[#allocation8 + $0x38] sm:$0xff]  ;;  %v265_v29 = vld [vmem:[#allocation8 + $0x30] sm:$0xff] }
  0x3d   :  { %439 = vmatprep.subr.mxu1 %v628_v0  ;;  %468 = vmatprep.subr.mxu0 %v628_v0  ;;  %v264_v30 = vld [vmem:[#allocation8 + $0x28] sm:$0xff]  ;;  %v263_v31 = vld [vmem:[#allocation8 + $0x20] sm:$0xff]  ;;  %v262_v32 = vld [vmem:[#allocation8 + $0x18] sm:$0xff] }
  0x3e   :  { %440 = vmatpush3.msra.mxu1 %v176_v8  ;;  %469 = vmatpush3.msra.mxu0 %v273_v21  ;;  %v383_v33 = vld [vmem:[%s746_s2] ss:$0 sm:$0xff]  ;;  %v261_v38 = vld [vmem:[#allocation8 + $0x10] sm:$0xff]  ;;  %v259_v40 = vld [vmem:[#allocation8] sm:$0xff] }
  0x3f   :  { %441 = vmatprep.subr.mxu1 %v628_v0  ;;  %470 = vmatprep.subr.mxu0 %v628_v0  ;;  %v260_v39 = vld [vmem:[#allocation8 + $0x8] sm:$0xff] }
  0x40   :  { %442 = vmatpush3.msra.mxu1 %v175_v9  ;;  %471 = vmatpush3.msra.mxu0 %v272_v22  ;;  %v385_v41 = vld [vmem:[%s748_s4] ss:$0 sm:$0xff]  ;;  %s630_s4 = smov [#allocation10]  }
  0x41   :  { %443 = vmatprep.subr.mxu1 %v628_v0  ;;  %472 = vmatprep.subr.mxu0 %v628_v0  ;;  %v386_v48 = vld [vmem:[%s750_s6] ss:$0 sm:$0xff]  ;;  %s372_s24 = sshll.u32 %s630_s4, 4  ;;  %s373_s24 = int_to_ptr.vmem [resolvable:$true] %s372_s24 }
  0x42   :  { %444 = vmatpush3.msra.mxu1 %v174_v10  ;;  %473 = vmatpush3.msra.mxu0 %v271_v23  ;;  %s594_s6 = scalar_lea.vmem %s373_s24, 128  ;;  %p599_p7 = scmp.lt.s32.totalorder %s373_s24, %s373_s24 }
  0x43   :  { %445 = vmatprep.subr.mxu1 %v628_v0  ;;  %474 = vmatprep.subr.mxu0 %v628_v0  ;;  %p595_p6 = scmp.ne.s32.totalorder %s373_s24, %s594_s6  ;;  %p600_p8 = scmp.lt.s32.totalorder %s594_s6, %s594_s6 }
  0x44   :  { %446 = vmatpush3.msra.mxu1 %v173_v11  ;;  %475 = vmatpush3.msra.mxu0 %v270_v24 }
  0x45   :  { %447 = vmatprep.subr.mxu1 %v628_v0  ;;  %476 = vmatprep.subr.mxu0 %v628_v0  ;;  %p601_p9 = por %p600_p8, %p599_p7 }
  0x46   :  { %448 = vmatpush3.msra.mxu1 %v172_v12  ;;  %477 = vmatpush3.msra.mxu0 %v269_v25 }
  0x47   :  { %449 = vmatprep.subr.mxu1 %v628_v0  ;;  %478 = vmatprep.subr.mxu0 %v628_v0  ;;  %p602_p10 = pnand %p601_p9, %p595_p6 }
  0x48   :  { %450 = vmatpush3.msra.mxu1 %v171_v13  ;;  %479 = vmatpush3.msra.mxu0 %v268_v26 }
  0x49   :  { %451 = vmatprep.subr.mxu1 %v628_v0  ;;  %480 = vmatprep.subr.mxu0 %v628_v0 }
  0x4a   :  { %452 = vmatpush3.msra.mxu1 %v170_v14  ;;  %481 = vmatpush3.msra.mxu0 %v267_v27 }
  0x4b   :  { %453 = vmatprep.subr.mxu1 %v628_v0  ;;  %482 = vmatprep.subr.mxu0 %v628_v0 }
  0x4c   :  { %454 = vmatpush3.msra.mxu1 %v169_v15  ;;  %483 = vmatpush3.msra.mxu0 %v266_v28 }
  0x4d   :  { %455 = vmatprep.subr.mxu1 %v628_v0  ;;  %484 = vmatprep.subr.mxu0 %v628_v0 }
  0x4e   :  { %456 = vmatpush3.msra.mxu1 %v168_v16  ;;  %485 = vmatpush3.msra.mxu0 %v265_v29 }
  0x4f   :  { %457 = vmatprep.subr.mxu1 %v628_v0  ;;  %486 = vmatprep.subr.mxu0 %v628_v0 }
  0x50   :  { %458 = vmatpush3.msra.mxu1 %v167_v17  ;;  %487 = vmatpush3.msra.mxu0 %v264_v30 }
  0x51   :  { %459 = vmatprep.subr.mxu1 %v628_v0  ;;  %488 = vmatprep.subr.mxu0 %v628_v0 }
  0x52   :  { %460 = vmatpush3.msra.mxu1 %v166_v18  ;;  %489 = vmatpush3.msra.mxu0 %v263_v31 }
  0x53   :  { %461 = vmatprep.subr.mxu1 %v628_v0  ;;  %490 = vmatprep.subr.mxu0 %v628_v0 }
  0x54   :  { %462 = vmatpush3.msra.mxu1 %v165_v19  ;;  %491 = vmatpush3.msra.mxu0 %v262_v32 }
  0x55   :  { %492 = vmatprep.subr.mxu0 %v628_v0 }
  0x56   :  { %493 = vmatpush3.msra.mxu0 %v261_v38 }
  0x57   :  { %494 = vmatprep.subr.mxu0 %v628_v0 }
  0x58   :  { %495 = vmatpush3.msra.mxu0 %v260_v39 }
  0x59   :  { %496 = vmatprep.subr.mxu0 %v628_v0 }
  0x5a   :  { %497 = vmatpush3.msra.mxu0 %v259_v40 }
  0xf9   :  { %v160_v34 = vpop.f32.mrf.mxu0 }
  0xfa   :  { %v161_v35 = vadd.f32 %v383_v33, %v160_v34 }
  0xfb   :  { %v430_v36 = vpop.f32.mrf.mxu0 }
  0xfc   :  { %v164_v37 = vmax.f32 %v161_v35, 0.0 }
  0xfe   :  { %464 = vmatmul.mubr.f32.vlgmr.msra.gmra.mxu1 %v164_v37 }
 0x1be   :  { %v254_v42 = vpop.f32.mrf.mxu1 }
 0x1bf   :  { %v255_v43 = vadd.f32 %v385_v41, %v254_v42 }
 0x1c0   :  { %v465_v44 = vpop.f32.mrf.mxu1 }
 0x1c1   :  { %v258_v45 = vmax.f32 %v255_v43, 0.0 }
 0x1c3   :  { %499 = vmatmul.mubr.f32.vlgmr.msra.gmra.mxu0 %v258_v45 }
 0x283   :  { %v348_v49 = vpop.f32.mrf.mxu0 }
 0x284   :  { %v349_v50 = vadd.f32 %v386_v48, %v348_v49 }
 0x285   :  { %v500_v51 = vpop.f32.mrf.mxu0 }
 0x286   :  { %v355_v52 = vsel %vm354_vm2, %v349_v50, -inf }
 0x287   :  { %356 = vmax.xlane.f32.xlu0 %v355_v52 }
 0x310   :  { %v357_v53 = vpop.xlane.xlu0 %356 }
 0x311   :  { %v358_v54 = vsub.f32 %v355_v52, %v357_v53 }
 0x313   :  { %v359_v55 = vmul.f32 1.442695, %v358_v54 }
 0x315   :  { %510 = vpow2.f32 %v359_v55 }
 0x322   :  { %v511_v56 = vpop.eup %510 }
 0x323   :  { %361 = vadd.xlane.f32.xlu0 %v511_v56 }
 0x3ac   :  { %v362_v57 = vpop.xlane.xlu0 %361 }
 0x3ad   :  { %512 = vrcp.f32 %v362_v57 }
 0x3ba   :  { %v513_v58 = vpop.eup %512 }
 0x3bb   :  { %v364_v59 = vmul.f32 %v513_v58, %v511_v56 }
 0x3bd   :  { %365 = vst [vmem:[#allocation10] sm:$0xff] %v364_v59 }
 0x3be   :  { %605 = shalt.err (!%p602_p10)
}
 0x3bf   :  { %375 = dma.vmem_to_hbm [thread:$0]  %s373_s24, 128, %s751_s7, [#allocation4]  }
 0x3c0   :  { %620 = dma.done.wait [#allocation4], 128  }
 0x3c1   :  { %621 = vsyncadd [#allocation4], 4294967168 }
 0x3c2   :  { %379 = vsyncpa [#allocation3], 1 }
 0x3c3   :  { %380 = vsyncpa [#allocation6], 1 }
 0x3c4   :  { %381 = vsyncpa [#allocation9], 1 }
 0x3c5   :  { %382 = vsyncpa [#allocation4], 1 }

</bundles_post_ra>
